<compile_context>
chip_gen: v7x
topology: tpu7x:2x2x1
jax: 0.10.0
libtpu: 0.0.40
codegen_flags: <defaults>
</compile_context>

<pallas_src>
import jax
import jax.numpy as jnp
from jax.experimental import pallas as pl
from jax.experimental.pallas import tpu as pltpu


# ----------------------------------------------------------------------------
# Kernel
# ----------------------------------------------------------------------------
def _decoder_mlp_kernel(x_ref,
                        w1_ref, b1_ref,
                        w2_ref, b2_ref,
                        w3_ref, b3_ref,
                        alphas_ref,          # (3,) f32 in SMEM
                        out_ref):
    # Matmuls on the bf16 MXU fast path, f32 accumulation; bias/PReLU in f32.
    x = x_ref[...].astype(jnp.bfloat16)

    a1 = alphas_ref[0]
    a2 = alphas_ref[1]
    a3 = alphas_ref[2]

    h = jnp.dot(x, w1_ref[...], preferred_element_type=jnp.float32) + b1_ref[...]
    h = jnp.where(h > 0, h, h * a1)

    h = jnp.dot(h.astype(jnp.bfloat16), w2_ref[...],
                preferred_element_type=jnp.float32) + b2_ref[...]
    h = jnp.where(h > 0, h, h * a2)

    h = jnp.dot(h.astype(jnp.bfloat16), w3_ref[...],
                preferred_element_type=jnp.float32) + b3_ref[...]
    h = jnp.where(h > 0, h, h * a3)

    out_ref[...] = h.astype(out_ref.dtype)


# ----------------------------------------------------------------------------
# Wrapper
# ----------------------------------------------------------------------------
def _round_up(v, m):
    return (v + m - 1) // m * m


def _choose_tile(B, d_in, d_out, tile_b, itemsize, vmem_budget=8 << 20):
    """Pick a sublane-aligned batch tile.

    - At least 2 grid steps whenever B > 8 (v7x megacore uses both TCs).
    - Double-buffered x/out tiles kept well under a conservative VMEM budget
      (v7x has only 64 MiB physical / 32 MiB default scoped VMEM).
    """
    tb = min(tile_b, max(8, _round_up(pl.cdiv(B, 2), 8)))
    while tb > 8 and 2 * tb * (d_in + d_out) * itemsize > vmem_budget:
        tb = _round_up(tb // 2, 8)
    return tb


def decoder_mlp(x, kernel_params, *, tile_b=512):
    """Fused Linear->PReLU x3 on a (B, d_in) input. Returns (B, d_out)."""
    B, d_in = x.shape
    w1, b1, w2, b2, w3, b3, alphas = kernel_params
    assert w1.shape[0] == d_in, (w1.shape, d_in)
    H = w1.shape[1]
    d_out = w3.shape[1]

    tb = _choose_tile(B, d_in, d_out, tile_b, x.dtype.itemsize)
    B_pad = _round_up(B, tb)
    if B_pad != B:
        # Explicit pad (no silent tile_b=B fallback): keeps the grid shape and
        # VMEM footprint predictable on all generations.
        x = jnp.pad(x, ((0, B_pad - B), (0, 0)))
    grid = (B_pad // tb,)

    # Rank-2 views so biases map onto (sublane, lane).
    b1_2d, b2_2d, b3_2d = b1.reshape(1, -1), b2.reshape(1, -1), b3.reshape(1, -1)

    def resident(shape):
        # Full-array resident VMEM block (weights / biases): same block every
        # grid step, loaded once per core.
        return pl.BlockSpec(shape, lambda i: (0, 0))

    flops = 2 * B_pad * (d_in * H + H * H + H * d_out)
    bytes_accessed = (
        x.dtype.itemsize * B_pad * (d_in + d_out)          # activations in/out
        + 2 * (d_in * H + H * H + H * d_out)               # bf16 weights
        + 4 * (2 * H + d_out + 3)                          # f32 biases + alphas
    )

    out = pl.pallas_call(
        _decoder_mlp_kernel,
        out_shape=jax.ShapeDtypeStruct((B_pad, d_out), x.dtype),
        grid_spec=pltpu.PrefetchScalarGridSpec(
            num_scalar_prefetch=0,
            grid=grid,
            in_specs=[
                pl.BlockSpec((tb, d_in), lambda i: (i, 0)),        # x tile
                resident((d_in, H)), resident((1, H)),             # layer 1
                resident((H, H)),    resident((1, H)),             # layer 2
                resident((H, d_out)), resident((1, d_out)),        # layer 3
                pl.BlockSpec(memory_space=pltpu.MemorySpace.SMEM),  # alphas
            ],
            out_specs=pl.BlockSpec((tb, d_out), lambda i: (i, 0)),
        ),
        compiler_params=pltpu.CompilerParams(
            dimension_semantics=("parallel",),
        ),
        cost_estimate=pl.CostEstimate(
            flops=flops, transcendentals=0, bytes_accessed=bytes_accessed),
    )(x, w1, b1_2d, w2, b2_2d, w3, b3_2d, alphas)

    return out[:B] if B_pad != B else out


def _mlp_xla(x, kernel_params):
    """Plain-XLA fallback for tiny batches (same numerics as the kernel)."""
    w1, b1, w2, b2, w3, b3, alphas = kernel_params
    h = jnp.dot(x.astype(jnp.bfloat16), w1,
                preferred_element_type=jnp.float32) + b1
    h = jnp.where(h > 0, h, h * alphas[0])
    h = jnp.dot(h.astype(jnp.bfloat16), w2,
                preferred_element_type=jnp.float32) + b2
    h = jnp.where(h > 0, h, h * alphas[1])
    h = jnp.dot(h.astype(jnp.bfloat16), w3,
                preferred_element_type=jnp.float32) + b3
    h = jnp.where(h > 0, h, h * alphas[2])
    return h.astype(x.dtype)


# ----------------------------------------------------------------------------
# Parameters / forward / reference
# ----------------------------------------------------------------------------
def init_decoder_params(key, n_in, n_h, hidden_size=128):
    """Params for network1..network7 (PyTorch-default-style init)."""
    def linear(k, din, dout):
        bound = float(din) ** -0.5
        kw, kb = jax.random.split(k)
        w = jax.random.uniform(kw, (din, dout), jnp.float32, -bound, bound)
        b = jax.random.uniform(kb, (dout,), jnp.float32, -bound, bound)
        return w, b

    params = {}
    for k in range(1, 8):
        d_in = n_h * k
        key, k1, k2, k3 = jax.random.split(key, 4)
        w1, b1 = linear(k1, d_in, hidden_size)
        w2, b2 = linear(k2, hidden_size, hidden_size)
        w3, b3 = linear(k3, hidden_size, n_in)
        a1 = jnp.full((1,), 0.25, jnp.float32)   # nn.PReLU default alpha
        a2 = jnp.full((1,), 0.25, jnp.float32)
        a3 = jnp.full((1,), 0.25, jnp.float32)

        # Kernel-ready tensors:
        #  * w1 zero-padded by 2*n_h rows so the kernel can consume the full
        #    h_raw.reshape(B, sub_size*n_h) without the host-side slice
        #    (sub_size == k + 2 in the module's forward -> dropped nodes hit
        #    zero rows and contribute nothing).
        #  * weights in bf16 (MXU fast path, half the weight DMA); biases f32;
        #    the three PReLU alphas packed into one (3,) SMEM-bound array.
        w1_pad = jnp.concatenate(
            [w1, jnp.zeros((2 * n_h, hidden_size), jnp.float32)], axis=0)
        alphas = jnp.concatenate([a1, a2, a3]).astype(jnp.float32)
        params[k] = {
            "torch": (w1, b1, a1, w2, b2, a2, w3, b3, a3),
            "kernel": (w1_pad.astype(jnp.bfloat16), b1,
                       w2.astype(jnp.bfloat16), b2,
                       w3.astype(jnp.bfloat16), b3,
                       alphas),
        }
    return params


def decoder_forward(params, h_raw, subgraph_size, *, tile_b=512,
                    min_pallas_batch=0):
    """Pallas equivalent of Decoder.forward(h_raw, subgraph_size)."""
    B, sub_size, n_h = h_raw.shape
    # The module is only consistent when (sub_size - 2) == subgraph_size.
    assert sub_size == subgraph_size + 2, (sub_size, subgraph_size)
    # Full reshape is a free contiguous view -- the "drop last 2 nodes" slice
    # is folded into w1's zero rows, saving one HBM pass over the activations.
    x = h_raw.reshape(B, sub_size * n_h)
    kp = params[subgraph_size]["kernel"]     # static network selection
    if B < min_pallas_batch:
        return _mlp_xla(x, kp)
    return decoder_mlp(x, kp, tile_b=tile_b)


def decoder_ref(params, h_raw, subgraph_size):
    """Plain-JAX f32 reference (same semantics as the PyTorch module)."""
    B, sub_size, _ = h_raw.shape
    x = h_raw[:, :sub_size - 2, :].reshape(B, -1)
    w1, b1, a1, w2, b2, a2, w3, b3, a3 = params[subgraph_size]["torch"]
    hp = jax.lax.Precision.HIGHEST
    h = jnp.dot(x, w1, precision=hp) + b1
    h = jnp.where(h > 0, h, a1 * h)
    h = jnp.dot(h, w2, precision=hp) + b2
    h = jnp.where(h > 0, h, a2 * h)
    h = jnp.dot(h, w3, precision=hp) + b3
    h = jnp.where(h > 0, h, a3 * h)
    return h


if __name__ == "__main__":
    key = jax.random.PRNGKey(0)

    # Shapes consistent with the module: network<k> expects input dim n_h*k and
    # forward drops the last 2 nodes, so sub_size = subgraph_size + 2.
    n_in, n_h, hidden_size = 64, 32, 128
    subgraph_size = 3
    batch = 250                       # not a tile multiple -> exercises padding
    sub_size = subgraph_size + 2

    pkey, dkey = jax.random.split(key)
    params = init_decoder_params(pkey, n_in, n_h, hidden_size)
    h_raw = jax.random.normal(dkey, (batch, sub_size, n_h), dtype=jnp.float32)

    out = decoder_forward(params, h_raw, subgraph_size)
    out = jax.block_until_ready(out)

    ref = decoder_ref(params, h_raw, subgraph_size)
    assert out.shape == (batch, n_in)
    max_err = float(jnp.max(jnp.abs(out - ref)))
    assert jnp.allclose(out, ref, atol=3e-2, rtol=3e-2), \
        f"Pallas Decoder mismatch vs reference (max abs err {max_err})"

    print("KERNEL_OK")
</pallas_src>

<mosaic_0001>
module attributes {stable_mosaic.version = 11 : i64} {
  func.func @_decoder_mlp_kernel(%arg0: i32, %arg1: memref<128x160xf32, #tpu.memory_space<vmem>>, %arg2: memref<160x128xbf16, #tpu.memory_space<vmem>>, %arg3: memref<1x128xf32, #tpu.memory_space<vmem>>, %arg4: memref<128x128xbf16, #tpu.memory_space<vmem>>, %arg5: memref<1x128xf32, #tpu.memory_space<vmem>>, %arg6: memref<128x64xbf16, #tpu.memory_space<vmem>>, %arg7: memref<1x64xf32, #tpu.memory_space<vmem>>, %arg8: memref<3xf32, #tpu.memory_space<smem>>, %arg9: memref<128x64xf32, #tpu.memory_space<vmem>>) attributes {dimension_semantics = [#tpu.dimension_semantics<parallel>], iteration_bounds = array<i64: 2>, scalar_prefetch = 0 : i64, scratch_operands = 0 : i64, tpu.core_type = #tpu.core_type<tc>, window_params = [{transform_indices = @transform_0, window_bounds = array<i64: 128, 160>}, {pipeline_mode = #tpu.pipeline_mode<synchronous>, transform_indices = @transform_1, window_bounds = array<i64: 160, 128>}, {pipeline_mode = #tpu.pipeline_mode<synchronous>, transform_indices = @transform_2, window_bounds = array<i64: 1, 128>}, {pipeline_mode = #tpu.pipeline_mode<synchronous>, transform_indices = @transform_3, window_bounds = array<i64: 128, 128>}, {pipeline_mode = #tpu.pipeline_mode<synchronous>, transform_indices = @transform_4, window_bounds = array<i64: 1, 128>}, {pipeline_mode = #tpu.pipeline_mode<synchronous>, transform_indices = @transform_5, window_bounds = array<i64: 128, 64>}, {pipeline_mode = #tpu.pipeline_mode<synchronous>, transform_indices = @transform_6, window_bounds = array<i64: 1, 64>}, {transform_indices = @transform_7, window_bounds = array<i64: 3>}, {transform_indices = @transform_8, window_bounds = array<i64: 128, 64>}]} {
    %c0 = arith.constant 0 : index
    %c0_0 = arith.constant 0 : index
    %0 = vector.load %arg1[%c0, %c0_0] : memref<128x160xf32, #tpu.memory_space<vmem>>, vector<128x160xf32>
    %1 = arith.truncf %0 : vector<128x160xf32> to vector<128x160xbf16>
    %c0_1 = arith.constant 0 : index
    %2 = memref.load %arg8[%c0_1] : memref<3xf32, #tpu.memory_space<smem>>
    %c1 = arith.constant 1 : index
    %3 = memref.load %arg8[%c1] : memref<3xf32, #tpu.memory_space<smem>>
    %c2 = arith.constant 2 : index
    %4 = memref.load %arg8[%c2] : memref<3xf32, #tpu.memory_space<smem>>
    %c0_2 = arith.constant 0 : index
    %c0_3 = arith.constant 0 : index
    %5 = vector.load %arg2[%c0_2, %c0_3] : memref<160x128xbf16, #tpu.memory_space<vmem>>, vector<160x128xbf16>
    %cst = arith.constant dense<0.000000e+00> : vector<128x128xf32>
    %6 = tpu.matmul %1, %5, %cst {dimension_numbers = #tpu.dot_dimension_numbers<[1], [0], [0], [1], [0, 0, 1, 1], [], []>} : vector<128x160xbf16>, vector<160x128xbf16>, vector<128x128xf32> -> vector<128x128xf32>
    %c0_4 = arith.constant 0 : index
    %c0_5 = arith.constant 0 : index
    %7 = vector.load %arg3[%c0_4, %c0_5] : memref<1x128xf32, #tpu.memory_space<vmem>>, vector<1x128xf32>
    %8 = vector.broadcast %7 : vector<1x128xf32> to vector<128x128xf32>
    %9 = arith.addf %6, %8 : vector<128x128xf32>
    %cst_6 = arith.constant 0.000000e+00 : f32
    %10 = vector.broadcast %cst_6 : f32 to vector<128x128xf32>
    %11 = arith.cmpf ogt, %9, %10 : vector<128x128xf32>
    %12 = vector.broadcast %2 : f32 to vector<128x128xf32>
    %13 = arith.mulf %9, %12 : vector<128x128xf32>
    %14 = arith.select %11, %9, %13 : vector<128x128xi1>, vector<128x128xf32>
    %15 = arith.truncf %14 : vector<128x128xf32> to vector<128x128xbf16>
    %c0_7 = arith.constant 0 : index
    %c0_8 = arith.constant 0 : index
    %16 = vector.load %arg4[%c0_7, %c0_8] : memref<128x128xbf16, #tpu.memory_space<vmem>>, vector<128x128xbf16>
    %cst_9 = arith.constant dense<0.000000e+00> : vector<128x128xf32>
    %17 = tpu.matmul %15, %16, %cst_9 {dimension_numbers = #tpu.dot_dimension_numbers<[1], [0], [0], [1], [0, 0, 1, 1], [], []>} : vector<128x128xbf16>, vector<128x128xbf16>, vector<128x128xf32> -> vector<128x128xf32>
    %c0_10 = arith.constant 0 : index
    %c0_11 = arith.constant 0 : index
    %18 = vector.load %arg5[%c0_10, %c0_11] : memref<1x128xf32, #tpu.memory_space<vmem>>, vector<1x128xf32>
    %19 = vector.broadcast %18 : vector<1x128xf32> to vector<128x128xf32>
    %20 = arith.addf %17, %19 : vector<128x128xf32>
    %cst_12 = arith.constant 0.000000e+00 : f32
    %21 = vector.broadcast %cst_12 : f32 to vector<128x128xf32>
    %22 = arith.cmpf ogt, %20, %21 : vector<128x128xf32>
    %23 = vector.broadcast %3 : f32 to vector<128x128xf32>
    %24 = arith.mulf %20, %23 : vector<128x128xf32>
    %25 = arith.select %22, %20, %24 : vector<128x128xi1>, vector<128x128xf32>
    %26 = arith.truncf %25 : vector<128x128xf32> to vector<128x128xbf16>
    %c0_13 = arith.constant 0 : index
    %c0_14 = arith.constant 0 : index
    %27 = vector.load %arg6[%c0_13, %c0_14] : memref<128x64xbf16, #tpu.memory_space<vmem>>, vector<128x64xbf16>
    %cst_15 = arith.constant dense<0.000000e+00> : vector<128x64xf32>
    %28 = tpu.matmul %26, %27, %cst_15 {dimension_numbers = #tpu.dot_dimension_numbers<[1], [0], [0], [1], [0, 0, 1, 1], [], []>} : vector<128x128xbf16>, vector<128x64xbf16>, vector<128x64xf32> -> vector<128x64xf32>
    %c0_16 = arith.constant 0 : index
    %c0_17 = arith.constant 0 : index
    %29 = vector.load %arg7[%c0_16, %c0_17] : memref<1x64xf32, #tpu.memory_space<vmem>>, vector<1x64xf32>
    %30 = vector.broadcast %29 : vector<1x64xf32> to vector<128x64xf32>
    %31 = arith.addf %28, %30 : vector<128x64xf32>
    %cst_18 = arith.constant 0.000000e+00 : f32
    %32 = vector.broadcast %cst_18 : f32 to vector<128x64xf32>
    %33 = arith.cmpf ogt, %31, %32 : vector<128x64xf32>
    %34 = vector.broadcast %4 : f32 to vector<128x64xf32>
    %35 = arith.mulf %31, %34 : vector<128x64xf32>
    %36 = arith.select %33, %31, %35 : vector<128x64xi1>, vector<128x64xf32>
    %c0_19 = arith.constant 0 : index
    %c0_20 = arith.constant 0 : index
    %37 = vector.load %arg9[%c0_19, %c0_20] : memref<128x64xf32, #tpu.memory_space<vmem>>, vector<128x64xf32>
    tpu.vector_store %arg9[%c0_19, %c0_20], %36 {strides = array<i32>} : memref<128x64xf32, #tpu.memory_space<vmem>>, vector<128x64xf32>,
    return
  }
  func.func @transform_0(%arg0: i32) -> (i32, i32) {
    %c0_i32 = arith.constant 0 : i32
    %c0_i32_0 = arith.constant 0 : i32
    return %arg0, %c0_i32 : i32, i32
  }
  func.func @transform_1(%arg0: i32) -> (i32, i32) {
    %c0_i32 = arith.constant 0 : i32
    %c0_i32_0 = arith.constant 0 : i32
    %c0_i32_1 = arith.constant 0 : i32
    return %c0_i32, %c0_i32_0 : i32, i32
  }
  func.func @transform_2(%arg0: i32) -> (i32, i32) {
    %c0_i32 = arith.constant 0 : i32
    %c0_i32_0 = arith.constant 0 : i32
    %c0_i32_1 = arith.constant 0 : i32
    return %c0_i32, %c0_i32_0 : i32, i32
  }
  func.func @transform_3(%arg0: i32) -> (i32, i32) {
    %c0_i32 = arith.constant 0 : i32
    %c0_i32_0 = arith.constant 0 : i32
    %c0_i32_1 = arith.constant 0 : i32
    return %c0_i32, %c0_i32_0 : i32, i32
  }
  func.func @transform_4(%arg0: i32) -> (i32, i32) {
    %c0_i32 = arith.constant 0 : i32
    %c0_i32_0 = arith.constant 0 : i32
    %c0_i32_1 = arith.constant 0 : i32
    return %c0_i32, %c0_i32_0 : i32, i32
  }
  func.func @transform_5(%arg0: i32) -> (i32, i32) {
    %c0_i32 = arith.constant 0 : i32
    %c0_i32_0 = arith.constant 0 : i32
    %c0_i32_1 = arith.constant 0 : i32
    return %c0_i32, %c0_i32_0 : i32, i32
  }
  func.func @transform_6(%arg0: i32) -> (i32, i32) {
    %c0_i32 = arith.constant 0 : i32
    %c0_i32_0 = arith.constant 0 : i32
    %c0_i32_1 = arith.constant 0 : i32
    return %c0_i32, %c0_i32_0 : i32, i32
  }
  func.func @transform_7(%arg0: i32) -> i32 {
    %c0_i32 = arith.constant 0 : i32
    %c0_i32_0 = arith.constant 0 : i32
    return %c0_i32 : i32
  }
  func.func @transform_8(%arg0: i32) -> (i32, i32) {
    %c0_i32 = arith.constant 0 : i32
    %c0_i32_0 = arith.constant 0 : i32
    return %arg0, %c0_i32 : i32, i32
  }
}

</mosaic_0001>

<bundles_post_ra>
// kernel: tpu_custom_call.1
= control target key start
LH: loop header
LB: loop body
LE: loop exit
PB: predicated region body
PF: predicated region fallthrough
CT: control target
= control target key end

     0   :  { %13 = vsyncpa [#allocation3], 0  ;;  %s1441_s27 = smov 0   ;;  %s1754_s0 = inlined_call_operand.vmem [shape: f32[256,160], index: 0, kind: input, shape index: {}]   ;;  %s1755_s1 = inlined_call_operand.vmem [shape: bf16[160,128], index: 1, kind: input, shape index: {}]   ;;  %s1756_s2 = inlined_call_operand.vmem [shape: f32[1,128], index: 2, kind: input, shape index: {}]   ;;  %s1757_s3 = inlined_call_operand.vmem [shape: bf16[128,128], index: 3, kind: input, shape index: {}]   ;;  %s1758_s4 = inlined_call_operand.vmem [shape: f32[1,128], index: 4, kind: input, shape index: {}]   ;;  %s1759_s5 = inlined_call_operand.vmem [shape: bf16[128,64], index: 5, kind: input, shape index: {}]   ;;  %s1760_s6 = inlined_call_operand.vmem [shape: f32[1,64], index: 6, kind: input, shape index: {}]   ;;  %s1761_s7 = inlined_call_operand.vmem [shape: f32[3], index: 7, kind: input, shape index: {}]   ;;  %s1762_s8 = inlined_call_operand.vmem [shape: f32[256,64], index: 8, kind: output, shape index: {}]  }
   0x1 LB: > { %s1171_s28 = sadd.s32 4294967295, %s1392_s27   ;;  %p1173_p0 = scmp.ge.s32.totalorder %s1392_s27, 1  ;;  %s1392_s27 = sphi %s1441_s27, %s19_s27  }
   0x2   : > { %p223_p1 = scmp.lt.s32.totalorder %s1392_s27, 3  ;;  %s254_s9 = sshll.u32 %s1761_s7, 4  ;;  %s255_s9 = int_to_ptr.vmem [resolvable:$true] %s254_s9 }
   0x3   : > { %p1456_p3 = scmp.eq.s32.totalorder %s1171_s28, 0  ;;  %s1367_s12 = scalar_lea.vmem %s255_s9, 16 }
   0x4   : > { %p1452_p2 = pnand %p1173_p0, %p223_p1  ;;  %p1368_p6 = scmp.ne.s32.totalorder %s255_s9, %s1367_s12 }
   0x5   : > { %p1375_p10 = scmp.lt.s32.totalorder %s255_s9, %s255_s9  ;;  %p1376_p11 = scmp.lt.s32.totalorder %s1367_s12, %s1367_s12 }
   0x6   : > { %p1325_p4 = pneg %p1452_p2 }
   0x7   : > { %p1377_p12 = por %p1376_p11, %p1375_p10 }
   0x8   : > { %p1326_p5 = pnand %p1456_p3, %p1325_p4 }
   0xa   : > { %p1369_p7 = pneg %p1326_p5 }
   0xc   : > { %p1370_p8 = pnand %p1369_p7, %p1368_p6 }
   0xe   : > { %p1371_p9 = pneg %p1370_p8 }
  0x10   : > { %p1378_p13 = pnand %p1377_p12, %p1371_p9 }
  0x12   : > { %1381 = shalt.err (!%p1378_p13)
}
  0x13   : > { %s1394_s13 = smov [#allocation2]   ;;  %277 = sbr.rel (%p1452_p2) target bundleno = 791 (0x317), region = 52 }
  0x14   : > { %1328 = dma.vmem_to_smem (!%p1326_p5), %s255_s9, 16, %s1394_s13, [#allocation3]  }
  0x1a   : > { %1387 = dma.done.wait (%p1456_p3), [#allocation3], 16  }
  0x1b   : > { %1389 = vsyncadd (%p1456_p3), [#allocation3], 4294967280 }
  0x1c   : > { %283 = sfence }
  0x1d   : > { %v1341_v0 = vld [vmem:[%s1755_s1] sm:$0xff]   ;;  %v1395_v1 = vmov 0   ;;  %s1178_s16 = sshll.u32 %s1171_s28, 4  ;;  %v1342_v2 = vld [vmem:[%s1755_s1 + $0x8] sm:$0xff]   ;;  %v1343_v3 = vld [vmem:[%s1755_s1 + $0x10] sm:$0xff]   ;;  %vm465_vm0 = vcmask 261120  }
  0x1e   : > { %490 = vmatprep.subr.bf16.mxu0 %v1395_v1  ;;  %p314_p0 = scmp.lt.s32.totalorder %s1178_s16, 31  ;;  %v1344_v4 = vld [vmem:[%s1755_s1 + $0x18] sm:$0xff]   ;;  %v1345_v8 = vld [vmem:[%s1755_s1 + $0x20] sm:$0xff]   ;;  %v1346_v9 = vld [vmem:[%s1755_s1 + $0x28] sm:$0xff]   ;;  %s375_s17 = sld [smem:[#allocation2]] }
  0x1f   : > { %491 = vmatpush1.bf16.msra.mxu0 %v1341_v0  ;;  %v1347_v10 = vld [vmem:[%s1755_s1 + $0x30] sm:$0xff]   ;;  %v1351_v11 = vld [vmem:[%s1757_s3] sm:$0xff]   ;;  %v1352_v12 = vld [vmem:[%s1757_s3 + $0x8] sm:$0xff]   ;;  %s1183_s13 = sld [smem:[#allocation2 + $0x1]] }
  0x20   : > { %492 = vmatprep.subr.bf16.mxu0 %v1395_v1  ;;  %s1766_s16 = smov (!%p314_p0, %s1178_s16), 31  ;;  %1257 = vmatprep.subr.bf16.mxu1 %v1351_v11  ;;  %v1348_v13 = vld [vmem:[%s1755_s1 + $0x38] sm:$0xff]   ;;  %v1353_v14 = vld [vmem:[%s1757_s3 + $0x10] sm:$0xff]   ;;  %v1349_v16 = vld [vmem:[%s1755_s1 + $0x40] sm:$0xff]  }
  0x21   : > { %s1224_s21 = sshll.u32 %s1766_s16, 4  ;;  %1258 = vmatpush3.bf16.msra.mxu1 %v1351_v11  ;;  %v1354_v15 = vld [vmem:[%s1757_s3 + $0x18] sm:$0xff]   ;;  %v1350_v17 = vld [vmem:[%s1755_s1 + $0x48] sm:$0xff]   ;;  %v1355_v63 = vld [vmem:[%s1757_s3 + $0x20] sm:$0xff]   ;;  %s1182_s20 = sshll.u32 %s1766_s16, 3 }
  0x22   : > { %s1485_s24 = scalar_lea.vmem %s1754_s0, %s1224_s21  ;;  %1259 = vmatprep.subr.bf16.mxu1 %v1352_v12  ;;  %v1356_v0 = vld [vmem:[%s1757_s3 + $0x28] sm:$0xff]   ;;  %s1687_s23 = scalar_lea.vmem %s1762_s8, %s1182_s20 }
  0x23   : > { %493 = vmatpush1.bf16.msra.mxu0 %v1342_v2  ;;  %v328_v5 = vld [vmem:[%s1485_s24 + $0x8] sm:$0xff]  ;;  %v330_v6 = vld [vmem:[%s1485_s24 + $0x18] sm:$0xff]  ;;  %v327_v18 = vld [vmem:[%s1485_s24] sm:$0xff] }
  0x24   : > { %494 = vmatprep.subr.bf16.mxu0 %v1395_v1  ;;  %v360_v7 = vpack.c.bf16 %v330_v6, %v328_v5  ;;  %v329_v19 = vld [vmem:[%s1485_s24 + $0x10] sm:$0xff]  ;;  %v332_v20 = vld [vmem:[%s1485_s24 + $0x28] sm:$0xff]  ;;  %v334_v21 = vld [vmem:[%s1485_s24 + $0x38] sm:$0xff]  ;;  %v1580_v6 = vstv %s375_s17  ;;  %s1184_s17 = sld [smem:[#allocation2 + $0x2]] }
  0x25   : > { %1260 = vmatpush3.bf16.msra.mxu1 %v1352_v12  ;;  %v359_v22 = vpack.c.bf16 %v329_v19, %v327_v18  ;;  %v362_v23 = vpack.c.bf16 %v334_v21, %v332_v20  ;;  %v331_v24 = vld [vmem:[%s1485_s24 + $0x20] sm:$0xff]  ;;  %v333_v25 = vld [vmem:[%s1485_s24 + $0x30] sm:$0xff]  ;;  %v336_v26 = vld [vmem:[%s1485_s24 + $0x48] sm:$0xff] }
  0x26   : > { %1196 = vmatprep.mubr.msk.bf16.mxu0 %vm465_vm0, %v360_v7  ;;  %1261 = vmatprep.subr.bf16.mxu1 %v1353_v14  ;;  %v338_v27 = vld [vmem:[%s1485_s24 + $0x58] sm:$0xff]  ;;  %v361_v28 = vpack.c.bf16 %v333_v25, %v331_v24  ;;  %v335_v30 = vld [vmem:[%s1485_s24 + $0x40] sm:$0xff]  ;;  %v337_v31 = vld [vmem:[%s1485_s24 + $0x50] sm:$0xff] }
  0x27   : > { %495 = vmatpush1.bf16.msra.mxu0 %v1343_v3  ;;  %v364_v29 = vpack.c.bf16 %v338_v27, %v336_v26  ;;  %v340_v32 = vld [vmem:[%s1485_s24 + $0x68] sm:$0xff]  ;;  %v342_v33 = vld [vmem:[%s1485_s24 + $0x78] sm:$0xff]  ;;  %v363_v34 = vpack.c.bf16 %v337_v31, %v335_v30  ;;  %v339_v36 = vld [vmem:[%s1485_s24 + $0x60] sm:$0xff] }
  0x28   : > { %496 = vmatprep.subr.bf16.mxu0 %v1395_v1  ;;  %v366_v35 = vpack.c.bf16 %v342_v33, %v340_v32  ;;  %v341_v37 = vld [vmem:[%s1485_s24 + $0x70] sm:$0xff]  ;;  %v344_v38 = vld [vmem:[%s1485_s24 + $0x88] sm:$0xff]  ;;  %v346_v39 = vld [vmem:[%s1485_s24 + $0x98] sm:$0xff] }
  0x29   : > { %1262 = vmatpush3.bf16.msra.mxu1 %v1353_v14  ;;  %v365_v40 = vpack.c.bf16 %v341_v37, %v339_v36  ;;  %v368_v41 = vpack.c.bf16 %v346_v39, %v344_v38  ;;  %v343_v42 = vld [vmem:[%s1485_s24 + $0x80] sm:$0xff]  ;;  %v345_v43 = vld [vmem:[%s1485_s24 + $0x90] sm:$0xff]  ;;  %v348_v44 = vld [vmem:[%s1485_s24 + $0xa8] sm:$0xff] }
  0x2a   : > { %1263 = vmatprep.subr.bf16.mxu1 %v1354_v15  ;;  %v350_v45 = vld [vmem:[%s1485_s24 + $0xb8] sm:$0xff]  ;;  %v367_v46 = vpack.c.bf16 %v345_v43, %v343_v42  ;;  %v347_v48 = vld [vmem:[%s1485_s24 + $0xa0] sm:$0xff]  ;;  %v349_v49 = vld [vmem:[%s1485_s24 + $0xb0] sm:$0xff] }
  0x2b   : > { %497 = vmatpush1.bf16.msra.mxu0 %v1344_v4  ;;  %v370_v47 = vpack.c.bf16 %v350_v45, %v348_v44  ;;  %v352_v50 = vld [vmem:[%s1485_s24 + $0xc8] sm:$0xff]  ;;  %v354_v51 = vld [vmem:[%s1485_s24 + $0xd8] sm:$0xff]  ;;  %v369_v52 = vpack.c.bf16 %v349_v49, %v347_v48  ;;  %v351_v54 = vld [vmem:[%s1485_s24 + $0xc0] sm:$0xff] }
  0x2c   : > { %498 = vmatprep.subr.bf16.mxu0 %v1395_v1  ;;  %v372_v53 = vpack.c.bf16 %v354_v51, %v352_v50  ;;  %v353_v55 = vld [vmem:[%s1485_s24 + $0xd0] sm:$0xff]  ;;  %v356_v56 = vld [vmem:[%s1485_s24 + $0xe8] sm:$0xff]  ;;  %v358_v57 = vld [vmem:[%s1485_s24 + $0xf8] sm:$0xff] }
  0x2d   : > { %1264 = vmatpush3.bf16.msra.mxu1 %v1354_v15  ;;  %v371_v58 = vpack.c.bf16 %v353_v55, %v351_v54  ;;  %v374_v59 = vpack.c.bf16 %v358_v57, %v356_v56  ;;  %v355_v60 = vld [vmem:[%s1485_s24 + $0xe0] sm:$0xff]  ;;  %v357_v61 = vld [vmem:[%s1485_s24 + $0xf0] sm:$0xff]  ;;  %v1358_v2 = vld [vmem:[%s1757_s3 + $0x38] sm:$0xff]  }
  0x2e   : > { %v373_v62 = vpack.c.bf16 %v357_v61, %v355_v60  ;;  %1265 = vmatprep.subr.bf16.mxu1 %v1355_v63  ;;  %v1359_v3 = vld [vmem:[%s1759_s5] sm:$0xff]   ;;  %v1361_v36 = vld [vmem:[%s1759_s5 + $0x10] sm:$0xff]   ;;  %v1362_v42 = vld [vmem:[%s1759_s5 + $0x18] sm:$0xff]  }
  0x2f   : > { %499 = vmatpush1.bf16.msra.mxu0 %v1345_v8  ;;  %v1578_v4 = vld [vmem:[%s1756_s2] ss:$0 sm:$0xff] }
  0x30   : > { %500 = vmatprep.subr.bf16.mxu0 %v1395_v1  ;;  %v1363_v49 = vld [vmem:[%s1759_s5 + $0x20] sm:$0xff]  }
  0x31   : > { %1266 = vmatpush3.bf16.msra.mxu1 %v1355_v63 }
  0x32   : > { %1267 = vmatprep.subr.bf16.mxu1 %v1356_v0 }
  0x33   : > { %501 = vmatpush1.bf16.msra.mxu0 %v1346_v9 }
  0x34   : > { %502 = vmatprep.subr.bf16.mxu0 %v1395_v1 }
  0x35   : > { %1268 = vmatpush3.bf16.msra.mxu1 %v1356_v0 }
  0x37   : > { %503 = vmatpush1.bf16.msra.mxu0 %v1347_v10 }
  0x38   : > { %504 = vmatprep.subr.bf16.mxu0 %v1395_v1 }
  0x3b   : > { %505 = vmatpush1.bf16.msra.mxu0 %v1348_v13 }
  0x3c   : > { %506 = vmatprep.subr.bf16.mxu0 %v1395_v1 }
  0x3f   : > { %507 = vmatpush1.bf16.msra.mxu0 %v1349_v16 }
  0x40   : > { %508 = vmatprep.subr.bf16.mxu0 %v1395_v1  ;;  %v1357_v1 = vld [vmem:[%s1757_s3 + $0x30] sm:$0xff]  }
  0x41   : > { %1269 = vmatprep.subr.bf16.mxu1 %v1357_v1 }
  0x42   : > { %1270 = vmatpush3.bf16.msra.mxu1 %v1357_v1 }
  0x43   : > { %509 = vmatpush1.bf16.msra.mxu0 %v1350_v17  ;;  %1271 = vmatprep.subr.bf16.mxu1 %v1358_v2 }
  0x46   : > { %523 = vmatmul.mubr.bf16.vlgmr.msra.gmra.mrb[0].mxu0 %v359_v22  ;;  %1272 = vmatpush3.bf16.msra.mxu1 %v1358_v2 }
  0x47   : > { %1197 = vmatprep.mubr.msk.bf16.mxu0 %vm465_vm0, %v362_v23  ;;  %1289 = vmatprep.subr.bf16.mxu1 %v1359_v3 }
  0x4e   : > { %531 = vmatmul.mubr.bf16.gmra.mrb[4].mxu0 %v361_v28 }
  0x4f   : > { %1198 = vmatprep.mubr.msk.bf16.mxu0 %vm465_vm0, %v364_v29  ;;  %v1360_v29 = vld [vmem:[%s1759_s5 + $0x8] sm:$0xff]  }
  0x56   : > { %539 = vmatmul.mubr.bf16.gmra.mrb[8].mxu0 %v363_v34 }
  0x57   : > { %1199 = vmatprep.mubr.msk.bf16.mxu0 %vm465_vm0, %v366_v35 }
  0x5e   : > { %547 = vmatmul.mubr.bf16.gmra.mrb[12].mxu0 %v365_v40 }
  0x5f   : > { %1200 = vmatprep.mubr.msk.bf16.mxu0 %vm465_vm0, %v368_v41 }
  0x66   : > { %555 = vmatmul.mubr.bf16.gmra.mrb[16].mxu0 %v367_v46 }
  0x67   : > { %1201 = vmatprep.mubr.msk.bf16.mxu0 %vm465_vm0, %v370_v47 }
  0x6e   : > { %563 = vmatmul.mubr.bf16.gmra.mrb[20].mxu0 %v369_v52 }
  0x6f   : > { %1202 = vmatprep.mubr.msk.bf16.mxu0 %vm465_vm0, %v372_v53 }
  0x76   : > { %571 = vmatmul.mubr.bf16.gmra.mrb[24].mxu0 %v371_v58 }
  0x77   : > { %1203 = vmatprep.mubr.msk.bf16.mxu0 %vm465_vm0, %v374_v59 }
  0x7e   : > { %579 = vmatmul.mubr.bf16.gmra.mrb[28].mxu0 %v373_v62 }
 0x119   : > { %v524_v5 = vpop.f32.mrb[0].mxu0 }
 0x11a   : > { %v525_v7 = vadd.f32 %v1578_v4, %v524_v5  ;;  %v526_v8 = vpop.f32.mrb[1].mxu0 }
 0x11b   : > { %v527_v9 = vpop.f32.mrb[2].mxu0 }
 0x11c   : > { %v604_v10 = vmul.f32 %v1580_v6, %v525_v7  ;;  %v528_v11 = vadd.f32 %v1578_v4, %v527_v9  ;;  %v529_v12 = vpop.f32.mrb[3].mxu0  ;;  %vm587_vm1 = vcmp.gt.f32.partialorder %v525_v7, 0.0 }
 0x11e   : > { %v605_v13 = vmul.f32 %v1580_v6, %v528_v11  ;;  %vm588_vm2 = vcmp.gt.f32.partialorder %v528_v11, 0.0  ;;  %v620_v14 = vsel %vm587_vm1, %v525_v7, %v604_v10 }
 0x120   : > { %v621_v15 = vsel %vm588_vm2, %v528_v11, %v605_v13 }
 0x121   : > { %v532_v16 = vpop.f32.mrb[4].mxu0  ;;  %v636_v17 = vpack.c.bf16 %v621_v15, %v620_v14 }
 0x122   : > { %v533_v18 = vadd.f32 %v1578_v4, %v532_v16  ;;  %v534_v19 = vpop.f32.mrb[5].mxu0 }
 0x123   : > { %v535_v20 = vpop.f32.mrb[6].mxu0  ;;  %1273 = vmatprep.mubr.bf16.mxu1 %v636_v17 }
 0x124   : > { %v606_v21 = vmul.f32 %v1580_v6, %v533_v18  ;;  %v536_v22 = vadd.f32 %v1578_v4, %v535_v20  ;;  %v537_v23 = vpop.f32.mrb[7].mxu0  ;;  %vm589_vm3 = vcmp.gt.f32.partialorder %v533_v18, 0.0 }
 0x126   : > { %vm590_vm4 = vcmp.gt.f32.partialorder %v536_v22, 0.0  ;;  %v607_v24 = vmul.f32 %v1580_v6, %v536_v22  ;;  %v622_v25 = vsel %vm589_vm3, %v533_v18, %v606_v21 }
 0x128   : > { %v623_v26 = vsel %vm590_vm4, %v536_v22, %v607_v24 }
 0x129   : > { %v540_v27 = vpop.f32.mrb[8].mxu0  ;;  %v637_v28 = vpack.c.bf16 %v623_v26, %v622_v25 }
 0x12a   : > { %v541_v30 = vadd.f32 %v1578_v4, %v540_v27  ;;  %v542_v31 = vpop.f32.mrb[9].mxu0 }
 0x12b   : > { %v543_v32 = vpop.f32.mrb[10].mxu0  ;;  %1274 = vmatmul.mubr.bf16.vlgmr.msra.gmra.mrb[0].mxu1 %v637_v28 }
 0x12c   : > { %v608_v33 = vmul.f32 %v1580_v6, %v541_v30  ;;  %v544_v34 = vadd.f32 %v1578_v4, %v543_v32  ;;  %v545_v35 = vpop.f32.mrb[11].mxu0  ;;  %1290 = vmatpush3.bf16.msra.mxu1 %v1359_v3  ;;  %vm591_vm5 = vcmp.gt.f32.partialorder %v541_v30, 0.0 }
 0x12d   : > { %1291 = vmatprep.subr.bf16.mxu1 %v1360_v29 }
 0x12e   : > { %vm592_vm6 = vcmp.gt.f32.partialorder %v544_v34, 0.0  ;;  %v609_v37 = vmul.f32 %v1580_v6, %v544_v34  ;;  %v624_v38 = vsel %vm591_vm5, %v541_v30, %v608_v33 }
 0x130   : > { %v625_v39 = vsel %vm592_vm6, %v544_v34, %v609_v37  ;;  %1292 = vmatpush3.bf16.msra.mxu1 %v1360_v29  ;;  %v1365_v37 = vld [vmem:[%s1759_s5 + $0x30] sm:$0xff]  }
 0x131   : > { %v548_v40 = vpop.f32.mrb[12].mxu0  ;;  %v638_v41 = vpack.c.bf16 %v625_v39, %v624_v38  ;;  %1293 = vmatprep.subr.bf16.mxu1 %v1361_v36  ;;  %v1640_v39 = vstv %s1183_s13 }
 0x132   : > { %v549_v43 = vadd.f32 %v1578_v4, %v548_v40  ;;  %v550_v44 = vpop.f32.mrb[13].mxu0 }
 0x133   : > { %v551_v45 = vpop.f32.mrb[14].mxu0  ;;  %1277 = vmatprep.mubr.bf16.mxu1 %v638_v41 }
 0x134   : > { %v610_v46 = vmul.f32 %v1580_v6, %v549_v43  ;;  %v552_v47 = vadd.f32 %v1578_v4, %v551_v45  ;;  %v553_v48 = vpop.f32.mrb[15].mxu0  ;;  %1294 = vmatpush3.bf16.msra.mxu1 %v1361_v36  ;;  %vm593_vm7 = vcmp.gt.f32.partialorder %v549_v43, 0.0  ;;  %v1364_v36 = vld [vmem:[%s1759_s5 + $0x28] sm:$0xff]  }
 0x135   : > { %1295 = vmatprep.subr.bf16.mxu1 %v1362_v42 }
 0x136   : > { %vm594_vm8 = vcmp.gt.f32.partialorder %v552_v47, 0.0  ;;  %v611_v50 = vmul.f32 %v1580_v6, %v552_v47  ;;  %v626_v51 = vsel %vm593_vm7, %v549_v43, %v610_v46 }
 0x138   : > { %v627_v52 = vsel %vm594_vm8, %v552_v47, %v611_v50  ;;  %1296 = vmatpush3.bf16.msra.mxu1 %v1362_v42 }
 0x139   : > { %v556_v53 = vpop.f32.mrb[16].mxu0  ;;  %v639_v54 = vpack.c.bf16 %v627_v52, %v626_v51  ;;  %1297 = vmatprep.subr.bf16.mxu1 %v1363_v49 }
 0x13a   : > { %v557_v55 = vadd.f32 %v1578_v4, %v556_v53  ;;  %v558_v56 = vpop.f32.mrb[17].mxu0 }
 0x13b   : > { %v559_v57 = vpop.f32.mrb[18].mxu0  ;;  %1278 = vmatmul.mubr.bf16.gmra.mrb[4].mxu1 %v639_v54 }
 0x13c   : > { %v612_v58 = vmul.f32 %v1580_v6, %v557_v55  ;;  %v560_v59 = vadd.f32 %v1578_v4, %v559_v57  ;;  %v561_v60 = vpop.f32.mrb[19].mxu0  ;;  %1298 = vmatpush3.bf16.msra.mxu1 %v1363_v49  ;;  %vm595_vm9 = vcmp.gt.f32.partialorder %v557_v55, 0.0 }
 0x13d   : > { %1299 = vmatprep.subr.bf16.mxu1 %v1364_v36 }
 0x13e   : > { %vm596_vm10 = vcmp.gt.f32.partialorder %v560_v59, 0.0  ;;  %v613_v61 = vmul.f32 %v1580_v6, %v560_v59  ;;  %v628_v62 = vsel %vm595_vm9, %v557_v55, %v612_v58 }
 0x140   : > { %v629_v63 = vsel %vm596_vm10, %v560_v59, %v613_v61  ;;  %1300 = vmatpush3.bf16.msra.mxu1 %v1364_v36 }
 0x141   : > { %v564_v0 = vpop.f32.mrb[20].mxu0  ;;  %v640_v1 = vpack.c.bf16 %v629_v63, %v628_v62  ;;  %1301 = vmatprep.subr.bf16.mxu1 %v1365_v37 }
 0x142   : > { %v565_v2 = vadd.f32 %v1578_v4, %v564_v0  ;;  %v566_v3 = vpop.f32.mrb[21].mxu0 }
 0x143   : > { %v567_v5 = vpop.f32.mrb[22].mxu0  ;;  %1281 = vmatprep.mubr.bf16.mxu1 %v640_v1 }
 0x144   : > { %v614_v7 = vmul.f32 %v1580_v6, %v565_v2  ;;  %v568_v8 = vadd.f32 %v1578_v4, %v567_v5  ;;  %v569_v9 = vpop.f32.mrb[23].mxu0  ;;  %vm597_vm11 = vcmp.gt.f32.partialorder %v565_v2, 0.0  ;;  %1302 = vmatpush3.bf16.msra.mxu1 %v1365_v37 }
 0x146   : > { %vm598_vm12 = vcmp.gt.f32.partialorder %v568_v8, 0.0  ;;  %v615_v10 = vmul.f32 %v1580_v6, %v568_v8  ;;  %v630_v11 = vsel %vm597_vm11, %v565_v2, %v614_v7 }
 0x148   : > { %v631_v12 = vsel %vm598_vm12, %v568_v8, %v615_v10 }
 0x149   : > { %v572_v13 = vpop.f32.mrb[24].mxu0  ;;  %v641_v14 = vpack.c.bf16 %v631_v12, %v630_v11 }
 0x14a   : > { %v573_v15 = vadd.f32 %v1578_v4, %v572_v13  ;;  %v574_v16 = vpop.f32.mrb[25].mxu0 }
 0x14b   : > { %v575_v17 = vpop.f32.mrb[26].mxu0  ;;  %1282 = vmatmul.mubr.bf16.gmra.mrb[8].mxu1 %v641_v14 }
 0x14c   : > { %v616_v18 = vmul.f32 %v1580_v6, %v573_v15  ;;  %v576_v19 = vadd.f32 %v1578_v4, %v575_v17  ;;  %v577_v20 = vpop.f32.mrb[27].mxu0  ;;  %vm599_vm13 = vcmp.gt.f32.partialorder %v573_v15, 0.0 }
 0x14e   : > { %vm600_vm14 = vcmp.gt.f32.partialorder %v576_v19, 0.0  ;;  %v617_v21 = vmul.f32 %v1580_v6, %v576_v19  ;;  %v632_v22 = vsel %vm599_vm13, %v573_v15, %v616_v18 }
 0x150   : > { %v633_v23 = vsel %vm600_vm14, %v576_v19, %v617_v21 }
 0x151   : > { %v580_v24 = vpop.f32.mrb[28].mxu0  ;;  %v642_v25 = vpack.c.bf16 %v633_v23, %v632_v22 }
 0x152   : > { %v581_v26 = vadd.f32 %v1578_v4, %v580_v24  ;;  %v582_v27 = vpop.f32.mrb[29].mxu0 }
 0x153   : > { %v583_v28 = vpop.f32.mrb[30].mxu0  ;;  %1285 = vmatprep.mubr.bf16.mxu1 %v642_v25 }
 0x154   : > { %v618_v29 = vmul.f32 %v1580_v6, %v581_v26  ;;  %v584_v30 = vadd.f32 %v1578_v4, %v583_v28  ;;  %v585_v31 = vpop.f32.mrb[31].mxu0  ;;  %vm601_vm15 = vcmp.gt.f32.partialorder %v581_v26, 0.0  ;;  %v1366_v4 = vld [vmem:[%s1759_s5 + $0x38] sm:$0xff]  }
 0x155   : > { %1303 = vmatprep.subr.bf16.mxu1 %v1366_v4 }
 0x156   : > { %vm602_vm0 = vcmp.gt.f32.partialorder %v584_v30, 0.0  ;;  %v619_v32 = vmul.f32 %v1580_v6, %v584_v30  ;;  %v634_v33 = vsel %vm601_vm15, %v581_v26, %v618_v29  ;;  %1304 = vmatpush3.bf16.msra.mxu1 %v1366_v4  ;;  %v1638_v6 = vld [vmem:[%s1758_s4] ss:$0 sm:$0xff] }
 0x158   : > { %v635_v34 = vsel %vm602_vm0, %v584_v30, %v619_v32 }
 0x159   : > { %v643_v35 = vpack.c.bf16 %v635_v34, %v634_v33 }
 0x15b   : > { %1286 = vmatmul.mubr.bf16.gmra.mrb[12].mxu1 %v643_v35 }
 0x1fe   : > { %v1275_v38 = vpop.f32.mrb[0].mxu1 }
 0x1ff   : > { %v758_v40 = vadd.f32 %v1275_v38, %v1638_v6  ;;  %v749_v41 = vpop.f32.mrb[1].mxu1 }
 0x200   : > { %v750_v42 = vadd.f32 %v1638_v6, %v749_v41  ;;  %v1276_v43 = vpop.f32.mrb[2].mxu1 }
 0x201   : > { %v831_v44 = vmul.f32 %v1640_v39, %v758_v40  ;;  %v761_v45 = vadd.f32 %v1276_v43, %v1638_v6  ;;  %v752_v46 = vpop.f32.mrb[3].mxu1  ;;  %vm814_vm1 = vcmp.gt.f32.partialorder %v758_v40, 0.0 }
 0x202   : > { %v829_v47 = vmul.f32 %v1640_v39, %v750_v42  ;;  %v753_v48 = vadd.f32 %v1638_v6, %v752_v46  ;;  %vm812_vm2 = vcmp.gt.f32.partialorder %v750_v42, 0.0 }
 0x203   : > { %vm815_vm3 = vcmp.gt.f32.partialorder %v761_v45, 0.0  ;;  %v832_v49 = vmul.f32 %v1640_v39, %v761_v45  ;;  %v847_v51 = vsel %vm814_vm1, %v758_v40, %v831_v44 }
 0x204   : > { %vm813_vm4 = vcmp.gt.f32.partialorder %v753_v48, 0.0  ;;  %v830_v50 = vmul.f32 %v1640_v39, %v753_v48  ;;  %v845_v54 = vsel %vm812_vm2, %v750_v42, %v829_v47  ;;  %vm1086_vm2 = vcmask 523264  }
 0x205   : > { %v848_v52 = vsel %vm815_vm3, %v761_v45, %v832_v49 }
 0x206   : > { %v862_v53 = vpack.c.bf16 %v848_v52, %v847_v51  ;;  %v846_v55 = vsel %vm813_vm4, %v753_v48, %v830_v50  ;;  %v1680_v50 = vstv %s1184_s17 }
 0x207   : > { %v861_v56 = vpack.c.bf16 %v846_v55, %v845_v54 }
 0x209   : > { %1305 = vmatprep.mubr.bf16.mxu1 %v861_v56 }
 0x20a   : > { %1306 = vmatmul.mubr.bf16.vlgmr.msra.gmra.mrb[16].mxu1 %v862_v53 }
 0x20e   : > { %v1279_v57 = vpop.f32.mrb[4].mxu1 }
 0x20f   : > { %v774_v58 = vadd.f32 %v1279_v57, %v1638_v6  ;;  %v765_v59 = vpop.f32.mrb[5].mxu1 }
 0x210   : > { %v766_v60 = vadd.f32 %v1638_v6, %v765_v59  ;;  %v1280_v61 = vpop.f32.mrb[6].mxu1 }
 0x211   : > { %v835_v62 = vmul.f32 %v1640_v39, %v774_v58  ;;  %v777_v63 = vadd.f32 %v1280_v61, %v1638_v6  ;;  %v768_v0 = vpop.f32.mrb[7].mxu1  ;;  %vm818_vm5 = vcmp.gt.f32.partialorder %v774_v58, 0.0 }
 0x212   : > { %v833_v1 = vmul.f32 %v1640_v39, %v766_v60  ;;  %v769_v2 = vadd.f32 %v1638_v6, %v768_v0  ;;  %vm816_vm6 = vcmp.gt.f32.partialorder %v766_v60, 0.0 }
 0x213   : > { %vm819_vm7 = vcmp.gt.f32.partialorder %v777_v63, 0.0  ;;  %v836_v3 = vmul.f32 %v1640_v39, %v777_v63  ;;  %v851_v7 = vsel %vm818_vm5, %v774_v58, %v835_v62 }
 0x214   : > { %vm817_vm8 = vcmp.gt.f32.partialorder %v769_v2, 0.0  ;;  %v834_v5 = vmul.f32 %v1640_v39, %v769_v2  ;;  %v849_v9 = vsel %vm816_vm6, %v766_v60, %v833_v1 }
 0x215   : > { %v852_v8 = vsel %vm819_vm7, %v777_v63, %v836_v3 }
 0x216   : > { %v850_v10 = vsel %vm817_vm8, %v769_v2, %v834_v5  ;;  %v864_v11 = vpack.c.bf16 %v852_v8, %v851_v7 }
 0x217   : > { %v863_v12 = vpack.c.bf16 %v850_v10, %v849_v9 }
 0x219   : > { %1309 = vmatprep.mubr.bf16.mxu1 %v863_v12 }
 0x21a   : > { %1310 = vmatmul.mubr.bf16.gmra.mrb[20].mxu1 %v864_v11 }
 0x21e   : > { %v1283_v13 = vpop.f32.mrb[8].mxu1 }
 0x21f   : > { %v790_v14 = vadd.f32 %v1283_v13, %v1638_v6  ;;  %v781_v15 = vpop.f32.mrb[9].mxu1 }
 0x220   : > { %v782_v16 = vadd.f32 %v1638_v6, %v781_v15  ;;  %v1284_v17 = vpop.f32.mrb[10].mxu1 }
 0x221   : > { %v839_v18 = vmul.f32 %v1640_v39, %v790_v14  ;;  %v793_v19 = vadd.f32 %v1284_v17, %v1638_v6  ;;  %v784_v20 = vpop.f32.mrb[11].mxu1  ;;  %vm822_vm9 = vcmp.gt.f32.partialorder %v790_v14, 0.0 }
 0x222   : > { %v837_v21 = vmul.f32 %v1640_v39, %v782_v16  ;;  %v785_v22 = vadd.f32 %v1638_v6, %v784_v20  ;;  %vm820_vm10 = vcmp.gt.f32.partialorder %v782_v16, 0.0 }
 0x223   : > { %vm823_vm11 = vcmp.gt.f32.partialorder %v793_v19, 0.0  ;;  %v840_v23 = vmul.f32 %v1640_v39, %v793_v19  ;;  %v855_v25 = vsel %vm822_vm9, %v790_v14, %v839_v18 }
 0x224   : > { %vm821_vm12 = vcmp.gt.f32.partialorder %v785_v22, 0.0  ;;  %v838_v24 = vmul.f32 %v1640_v39, %v785_v22  ;;  %v853_v27 = vsel %vm820_vm10, %v782_v16, %v837_v21 }
 0x225   : > { %v856_v26 = vsel %vm823_vm11, %v793_v19, %v840_v23 }
 0x226   : > { %v854_v28 = vsel %vm821_vm12, %v785_v22, %v838_v24  ;;  %v866_v29 = vpack.c.bf16 %v856_v26, %v855_v25 }
 0x227   : > { %v865_v30 = vpack.c.bf16 %v854_v28, %v853_v27 }
 0x229   : > { %1313 = vmatprep.mubr.bf16.mxu1 %v865_v30 }
 0x22a   : > { %1314 = vmatmul.mubr.bf16.gmra.mrb[24].mxu1 %v866_v29 }
 0x22e   : > { %v1287_v31 = vpop.f32.mrb[12].mxu1 }
 0x22f   : > { %v806_v32 = vadd.f32 %v1287_v31, %v1638_v6  ;;  %v797_v33 = vpop.f32.mrb[13].mxu1 }
 0x230   : > { %v798_v34 = vadd.f32 %v1638_v6, %v797_v33  ;;  %v1288_v35 = vpop.f32.mrb[14].mxu1 }
 0x231   : > { %v843_v36 = vmul.f32 %v1640_v39, %v806_v32  ;;  %v809_v37 = vadd.f32 %v1288_v35, %v1638_v6  ;;  %v800_v4 = vpop.f32.mrb[15].mxu1  ;;  %vm826_vm13 = vcmp.gt.f32.partialorder %v806_v32, 0.0 }
 0x232   : > { %v841_v38 = vmul.f32 %v1640_v39, %v798_v34  ;;  %v801_v40 = vadd.f32 %v1638_v6, %v800_v4  ;;  %vm824_vm14 = vcmp.gt.f32.partialorder %v798_v34, 0.0  ;;  %v1677_v6 = vld [vmem:[%s1760_s6] ss:$0 sm:$0xff] }
 0x233   : > { %vm827_vm15 = vcmp.gt.f32.partialorder %v809_v37, 0.0  ;;  %v844_v41 = vmul.f32 %v1640_v39, %v809_v37  ;;  %v859_v43 = vsel %vm826_vm13, %v806_v32, %v843_v36 }
 0x234   : > { %vm825_vm0 = vcmp.gt.f32.partialorder %v801_v40, 0.0  ;;  %v842_v42 = vmul.f32 %v1640_v39, %v801_v40  ;;  %v857_v45 = vsel %vm824_vm14, %v798_v34, %v841_v38 }
 0x235   : > { %v860_v44 = vsel %vm827_vm15, %v809_v37, %v844_v41 }
 0x236   : > { %v858_v46 = vsel %vm825_vm0, %v801_v40, %v842_v42  ;;  %v868_v47 = vpack.c.bf16 %v860_v44, %v859_v43 }
 0x237   : > { %v867_v48 = vpack.c.bf16 %v858_v46, %v857_v45 }
 0x239   : > { %1317 = vmatprep.mubr.bf16.mxu1 %v867_v48 }
 0x23a   : > { %1318 = vmatmul.mubr.bf16.gmra.mrb[28].mxu1 %v868_v47 }
 0x2dd   : > { %v1307_v49 = vpop.f32.mrb[16].mxu1 }
 0x2de   : > { %v983_v39 = vadd.f32 %v1307_v49, %v1677_v6  ;;  %v974_v51 = vpop.f32.mrb[17].mxu1 }
 0x2df   : > { %v975_v52 = vadd.f32 %v1677_v6, %v974_v51  ;;  %v1308_v53 = vpop.f32.mrb[18].mxu1 }
 0x2e0   : > { %vm1039_vm1 = vcmp.gt.f32.partialorder %v983_v39, 0.0  ;;  %v1056_v54 = vmul.f32 %v1680_v50, %v983_v39  ;;  %v986_v55 = vadd.f32 %v1308_v53, %v1677_v6  ;;  %v977_v56 = vpop.f32.mrb[19].mxu1 }
 0x2e1   : > { %vm1037_vm3 = vcmp.gt.f32.partialorder %v975_v52, 0.0  ;;  %v1054_v57 = vmul.f32 %v1680_v50, %v975_v52  ;;  %v978_v58 = vadd.f32 %v1677_v6, %v977_v56 }
 0x2e2   : > { %v1072_v59 = vsel %vm1039_vm1, %v983_v39, %v1056_v54  ;;  %vm1040_vm4 = vcmp.gt.f32.partialorder %v986_v55, 0.0  ;;  %v1057_v60 = vmul.f32 %v1680_v50, %v986_v55 }
 0x2e3   : > { %1089 = vst.msk [vmem:[%s1687_s23 + $0x10] sm:$0xff] %vm1086_vm2, %v1072_v59  ;;  %v1070_v61 = vsel %vm1037_vm3, %v975_v52, %v1054_v57  ;;  %vm1038_vm5 = vcmp.gt.f32.partialorder %v978_v58, 0.0  ;;  %v1055_v62 = vmul.f32 %v1680_v50, %v978_v58 }
 0x2e4   : > { %1087 = vst.msk [vmem:[%s1687_s23] sm:$0xff] %vm1086_vm2, %v1070_v61  ;;  %v1073_v63 = vsel %vm1040_vm4, %v986_v55, %v1057_v60 }
 0x2e5   : > { %1090 = vst.msk [vmem:[%s1687_s23 + $0x18] sm:$0xff] %vm1086_vm2, %v1073_v63  ;;  %v1071_v0 = vsel %vm1038_vm5, %v978_v58, %v1055_v62 }
 0x2e6   : > { %1088 = vst.msk [vmem:[%s1687_s23 + $0x8] sm:$0xff] %vm1086_vm2, %v1071_v0 }
 0x2ed   : > { %v1311_v1 = vpop.f32.mrb[20].mxu1 }
 0x2ee   : > { %v999_v2 = vadd.f32 %v1311_v1, %v1677_v6  ;;  %v990_v3 = vpop.f32.mrb[21].mxu1 }
 0x2ef   : > { %v991_v5 = vadd.f32 %v1677_v6, %v990_v3  ;;  %v1312_v7 = vpop.f32.mrb[22].mxu1 }
 0x2f0   : > { %vm1043_vm6 = vcmp.gt.f32.partialorder %v999_v2, 0.0  ;;  %v1060_v8 = vmul.f32 %v1680_v50, %v999_v2  ;;  %v1002_v9 = vadd.f32 %v1312_v7, %v1677_v6  ;;  %v993_v10 = vpop.f32.mrb[23].mxu1 }
 0x2f1   : > { %vm1041_vm7 = vcmp.gt.f32.partialorder %v991_v5, 0.0  ;;  %v1058_v11 = vmul.f32 %v1680_v50, %v991_v5  ;;  %v994_v12 = vadd.f32 %v1677_v6, %v993_v10 }
 0x2f2   : > { %v1076_v13 = vsel %vm1043_vm6, %v999_v2, %v1060_v8  ;;  %vm1044_vm8 = vcmp.gt.f32.partialorder %v1002_v9, 0.0  ;;  %v1061_v14 = vmul.f32 %v1680_v50, %v1002_v9 }
 0x2f3   : > { %1093 = vst.msk [vmem:[%s1687_s23 + $0x30] sm:$0xff] %vm1086_vm2, %v1076_v13  ;;  %v1074_v15 = vsel %vm1041_vm7, %v991_v5, %v1058_v11  ;;  %vm1042_vm9 = vcmp.gt.f32.partialorder %v994_v12, 0.0  ;;  %v1059_v16 = vmul.f32 %v1680_v50, %v994_v12 }
 0x2f4   : > { %1091 = vst.msk [vmem:[%s1687_s23 + $0x20] sm:$0xff] %vm1086_vm2, %v1074_v15  ;;  %v1077_v17 = vsel %vm1044_vm8, %v1002_v9, %v1061_v14 }
 0x2f5   : > { %1094 = vst.msk [vmem:[%s1687_s23 + $0x38] sm:$0xff] %vm1086_vm2, %v1077_v17  ;;  %v1075_v18 = vsel %vm1042_vm9, %v994_v12, %v1059_v16 }
 0x2f6   : > { %1092 = vst.msk [vmem:[%s1687_s23 + $0x28] sm:$0xff] %vm1086_vm2, %v1075_v18 }
 0x2fd   : > { %v1315_v19 = vpop.f32.mrb[24].mxu1 }
 0x2fe   : > { %v1015_v20 = vadd.f32 %v1315_v19, %v1677_v6  ;;  %v1006_v21 = vpop.f32.mrb[25].mxu1 }
 0x2ff   : > { %v1007_v22 = vadd.f32 %v1677_v6, %v1006_v21  ;;  %v1316_v23 = vpop.f32.mrb[26].mxu1 }
 0x300   : > { %vm1047_vm10 = vcmp.gt.f32.partialorder %v1015_v20, 0.0  ;;  %v1064_v24 = vmul.f32 %v1680_v50, %v1015_v20  ;;  %v1018_v25 = vadd.f32 %v1316_v23, %v1677_v6  ;;  %v1009_v26 = vpop.f32.mrb[27].mxu1 }
 0x301   : > { %vm1045_vm11 = vcmp.gt.f32.partialorder %v1007_v22, 0.0  ;;  %v1062_v27 = vmul.f32 %v1680_v50, %v1007_v22  ;;  %v1010_v28 = vadd.f32 %v1677_v6, %v1009_v26 }
 0x302   : > { %v1080_v29 = vsel %vm1047_vm10, %v1015_v20, %v1064_v24  ;;  %vm1048_vm12 = vcmp.gt.f32.partialorder %v1018_v25, 0.0  ;;  %v1065_v30 = vmul.f32 %v1680_v50, %v1018_v25 }
 0x303   : > { %1097 = vst.msk [vmem:[%s1687_s23 + $0x50] sm:$0xff] %vm1086_vm2, %v1080_v29  ;;  %v1078_v31 = vsel %vm1045_vm11, %v1007_v22, %v1062_v27  ;;  %vm1046_vm13 = vcmp.gt.f32.partialorder %v1010_v28, 0.0  ;;  %v1063_v32 = vmul.f32 %v1680_v50, %v1010_v28 }
 0x304   : > { %1095 = vst.msk [vmem:[%s1687_s23 + $0x40] sm:$0xff] %vm1086_vm2, %v1078_v31  ;;  %v1081_v33 = vsel %vm1048_vm12, %v1018_v25, %v1065_v30 }
 0x305   : > { %1098 = vst.msk [vmem:[%s1687_s23 + $0x58] sm:$0xff] %vm1086_vm2, %v1081_v33  ;;  %v1079_v34 = vsel %vm1046_vm13, %v1010_v28, %v1063_v32 }
 0x306   : > { %1096 = vst.msk [vmem:[%s1687_s23 + $0x48] sm:$0xff] %vm1086_vm2, %v1079_v34 }
 0x30d   : > { %v1319_v35 = vpop.f32.mrb[28].mxu1 }
 0x30e   : > { %v1031_v36 = vadd.f32 %v1319_v35, %v1677_v6  ;;  %v1022_v37 = vpop.f32.mrb[29].mxu1 }
 0x30f   : > { %v1023_v4 = vadd.f32 %v1677_v6, %v1022_v37  ;;  %v1320_v38 = vpop.f32.mrb[30].mxu1 }
 0x310   : > { %vm1051_vm14 = vcmp.gt.f32.partialorder %v1031_v36, 0.0  ;;  %v1068_v40 = vmul.f32 %v1680_v50, %v1031_v36  ;;  %v1034_v41 = vadd.f32 %v1320_v38, %v1677_v6  ;;  %v1025_v42 = vpop.f32.mrb[31].mxu1 }
 0x311   : > { %vm1049_vm15 = vcmp.gt.f32.partialorder %v1023_v4, 0.0  ;;  %v1066_v43 = vmul.f32 %v1680_v50, %v1023_v4  ;;  %v1026_v44 = vadd.f32 %v1677_v6, %v1025_v42 }
 0x312   : > { %v1084_v45 = vsel %vm1051_vm14, %v1031_v36, %v1068_v40  ;;  %vm1052_vm0 = vcmp.gt.f32.partialorder %v1034_v41, 0.0  ;;  %v1069_v46 = vmul.f32 %v1680_v50, %v1034_v41 }
 0x313   : > { %1101 = vst.msk [vmem:[%s1687_s23 + $0x70] sm:$0xff] %vm1086_vm2, %v1084_v45  ;;  %v1082_v47 = vsel %vm1049_vm15, %v1023_v4, %v1066_v43  ;;  %vm1050_vm1 = vcmp.gt.f32.partialorder %v1026_v44, 0.0  ;;  %v1067_v48 = vmul.f32 %v1680_v50, %v1026_v44 }
 0x314   : > { %1099 = vst.msk [vmem:[%s1687_s23 + $0x60] sm:$0xff] %vm1086_vm2, %v1082_v47  ;;  %v1085_v49 = vsel %vm1052_vm0, %v1034_v41, %v1069_v46 }
 0x315   : > { %1102 = vst.msk [vmem:[%s1687_s23 + $0x78] sm:$0xff] %vm1086_vm2, %v1085_v49  ;;  %v1083_v39 = vsel %vm1050_vm1, %v1026_v44, %v1067_v48 }
 0x316   : > { %1100 = vst.msk [vmem:[%s1687_s23 + $0x68] sm:$0xff] %vm1086_vm2, %v1083_v39 }
 0x317 PF: > { %s19_s27 = sadd.s32 1, %s1392_s27  }
 0x318   : > { %p16_p1 = scmp.ge.s32.totalorder %s19_s27, 4  }
 0x31a   :  { %18 = sbr.rel (!%p16_p1) target bundleno = 1 (0x1), region = 87 }
 0x321   :  { %1125 = vsyncpa [#allocation3], 1 }
 0x322   :  { %1127 = vsyncpa [#allocation3 + $0x1], 1 }

</bundles_post_ra>
